<compile_context>
chip_gen: v7x
topology: tpu7x:2x2x1
jax: 0.10.0
libtpu: 0.0.40
codegen_flags: <defaults>
</compile_context>

<pallas_src>
from functools import partial

import jax
import jax.numpy as jnp
from jax.experimental import pallas as pl
from jax.experimental.pallas import tpu as pltpu


def _round_up(n, m):
    return ((n + m - 1) // m) * m


def _policy_kernel(x_ref, w1_ref, b1_ref, wd_ref, bd_ref, o_ref):
    # Per-grid-step shapes:
    #   x_ref : (K=4, TB) bf16  observations, batch on the lane axis
    #   w1_ref: (H, K)    bf16  l1.weight  (PyTorch layout)
    #   b1_ref: (H, 1)    f32   l1.bias
    #   wd_ref: (1, H)    bf16  l2.weight[0] - l2.weight[1]
    #   bd_ref: (1, 1)    f32   l2.bias[0]   - l2.bias[1]
    #   o_ref : (2, TB)   f32   rows = [p(action 0); p(action 1)]

    # Layer 1 on the MXU (bf16 operands, f32 accumulation), bias + ReLU on the VPU.
    h = jnp.dot(w1_ref[...], x_ref[...], preferred_element_type=jnp.float32)   # (H, TB)
    h = jnp.maximum(h + b1_ref[...], 0.0)

    # Layer 2 collapsed to the logit difference: one lane-dense (1,H)@(H,TB) bf16
    # MXU pass -> z = logit0 - logit1.
    z = jnp.dot(wd_ref[...], h.astype(jnp.bfloat16),
                preferred_element_type=jnp.float32) + bd_ref[...]               # (1, TB)

    # 2-class softmax == sigmoid(z). Use the tanh identity: one exact EUP op,
    # no approximate reciprocal. Row 1 = 1 - row 0, so rows sum to 1 exactly.
    p0 = 0.5 + 0.5 * jnp.tanh(0.5 * z)                                          # (1, TB)
    probs = jnp.concatenate([p0, 1.0 - p0], axis=0)                             # (2, TB)
    o_ref[...] = probs.astype(o_ref.dtype)


@partial(jax.jit, static_argnames=("block_b",))
def nn_policy_forward(x, w1, b1, w2, b2, *, block_b=8192):
    """NNPolicy forward pass: softmax(l2(relu(l1(x)))).

    Args (PyTorch parameter layouts):
      x : (B, 4)  float32 observations.
      w1: (H, 4)  l1.weight
      b1: (H,)    l1.bias
      w2: (2, H)  l2.weight
      b2: (2,)    l2.bias

    Returns:
      (B, 2) float32 action probabilities.
    """
    x = jnp.asarray(x, jnp.float32)
    B, K = x.shape
    H = w1.shape[0]

    # Batch-on-lanes layout: pad the batch up to a lane-tile multiple. The jit
    # around this wrapper fuses the transpose/pad/cast into a single pass over x.
    # NOTE(v7x): for very large batches pick block_b so Bp//tb >= 2 and the
    # "parallel" grid axis can shard across both TensorCores.
    tb = min(_round_up(block_b, 128), _round_up(max(B, 1), 128))
    Bp = _round_up(max(B, 1), tb)
    xT = jnp.zeros((K, Bp), jnp.bfloat16).at[:, :B].set(x.T.astype(jnp.bfloat16))

    w1b = jnp.asarray(w1, jnp.float32).astype(jnp.bfloat16)                 # (H, K)
    b1c = jnp.asarray(b1, jnp.float32).reshape(H, 1)                        # (H, 1)
    wd = (jnp.asarray(w2[0], jnp.float32)
          - jnp.asarray(w2[1], jnp.float32)).astype(jnp.bfloat16).reshape(1, H)
    bd = (jnp.asarray(b2[0], jnp.float32)
          - jnp.asarray(b2[1], jnp.float32)).reshape(1, 1)

    out = pl.pallas_call(
        _policy_kernel,
        out_shape=jax.ShapeDtypeStruct((2, Bp), jnp.float32),
        grid=(Bp // tb,),
        in_specs=[
            pl.BlockSpec((K, tb), lambda i: (0, i)),   # observations (batch tiled on lanes)
            pl.BlockSpec((H, K), lambda i: (0, 0)),    # l1.weight (VMEM-resident)
            pl.BlockSpec((H, 1), lambda i: (0, 0)),    # l1.bias
            pl.BlockSpec((1, H), lambda i: (0, 0)),    # l2 weight difference
            pl.BlockSpec((1, 1), lambda i: (0, 0)),    # l2 bias difference
        ],
        out_specs=pl.BlockSpec((2, tb), lambda i: (0, i)),
        compiler_params=pltpu.CompilerParams(
            dimension_semantics=("parallel",)),        # megacore-shardable on v7x
    )(xT, w1b, b1c, wd, bd)

    return out[:, :B].T                                # (B, 2)


def reference_forward(x, w1, b1, w2, b2):
    h = jnp.maximum(x @ w1.T + b1, 0.0)
    logits = h @ w2.T + b2
    return jax.nn.softmax(logits, axis=-1)


if __name__ == "__main__":
    key = jax.random.PRNGKey(0)
    k1, k2, k3, k4, kx = jax.random.split(key, 5)

    num_hidden = 128
    batch = 8

    # nn.Linear-style init (U[-1/sqrt(fan_in), 1/sqrt(fan_in)]), PyTorch layouts.
    bound1 = 1.0 / jnp.sqrt(4.0)
    bound2 = 1.0 / jnp.sqrt(float(num_hidden))
    w1 = jax.random.uniform(k1, (num_hidden, 4), jnp.float32, -bound1, bound1)
    b1 = jax.random.uniform(k2, (num_hidden,), jnp.float32, -bound1, bound1)
    w2 = jax.random.uniform(k3, (2, num_hidden), jnp.float32, -bound2, bound2)
    b2 = jax.random.uniform(k4, (2,), jnp.float32, -bound2, bound2)
    x = jax.random.normal(kx, (batch, 4), jnp.float32)

    probs = jax.block_until_ready(nn_policy_forward(x, w1, b1, w2, b2))
    ref = reference_forward(x, w1, b1, w2, b2)
    assert probs.shape == (batch, 2)
    # 3e-3 tolerance covers the bf16 MXU operands vs. the f32 reference.
    assert jnp.allclose(probs, ref, atol=3e-3), "mismatch vs reference"
    # Row 1 is written as 1 - row 0, so the two probabilities sum to 1 exactly
    # (up to one f32 rounding).
    assert jnp.allclose(jnp.sum(probs, axis=-1), 1.0, atol=1e-6), "probs do not sum to 1"

    # Ragged batch: exercises the padding path and a multi-step parallel grid.
    x2 = jax.random.normal(kx, (300, 4), jnp.float32)
    probs2 = jax.block_until_ready(nn_policy_forward(x2, w1, b1, w2, b2, block_b=128))
    ref2 = reference_forward(x2, w1, b1, w2, b2)
    assert probs2.shape == (300, 2)
    assert jnp.allclose(probs2, ref2, atol=3e-3), "mismatch vs reference (ragged batch)"
    assert jnp.allclose(jnp.sum(probs2, axis=-1), 1.0, atol=1e-6), "probs2 do not sum to 1"

    print("KERNEL_OK")
</pallas_src>

<mosaic_0001>
module attributes {stable_mosaic.version = 11 : i64} {
  func.func @_policy_kernel(%arg0: i32, %arg1: memref<4x128xbf16, #tpu.memory_space<vmem>>, %arg2: memref<128x4xbf16, #tpu.memory_space<vmem>>, %arg3: memref<128x1xf32, #tpu.memory_space<vmem>>, %arg4: memref<1x128xbf16, #tpu.memory_space<vmem>>, %arg5: memref<1x1xf32, #tpu.memory_space<vmem>>, %arg6: memref<2x128xf32, #tpu.memory_space<vmem>>) attributes {dimension_semantics = [#tpu.dimension_semantics<parallel>], iteration_bounds = array<i64: 1>, scalar_prefetch = 0 : i64, scratch_operands = 0 : i64, tpu.core_type = #tpu.core_type<tc>, window_params = [{transform_indices = @transform_0, window_bounds = array<i64: 4, 128>}, {pipeline_mode = #tpu.pipeline_mode<synchronous>, transform_indices = @transform_1, window_bounds = array<i64: 128, 4>}, {pipeline_mode = #tpu.pipeline_mode<synchronous>, transform_indices = @transform_2, window_bounds = array<i64: 128, 1>}, {pipeline_mode = #tpu.pipeline_mode<synchronous>, transform_indices = @transform_3, window_bounds = array<i64: 1, 128>}, {pipeline_mode = #tpu.pipeline_mode<synchronous>, transform_indices = @transform_4, window_bounds = array<i64: 1, 1>}, {transform_indices = @transform_5, window_bounds = array<i64: 2, 128>}]} {
    %c0 = arith.constant 0 : index
    %c0_0 = arith.constant 0 : index
    %0 = vector.load %arg2[%c0, %c0_0] : memref<128x4xbf16, #tpu.memory_space<vmem>>, vector<128x4xbf16>
    %c0_1 = arith.constant 0 : index
    %c0_2 = arith.constant 0 : index
    %1 = vector.load %arg1[%c0_1, %c0_2] : memref<4x128xbf16, #tpu.memory_space<vmem>>, vector<4x128xbf16>
    %cst = arith.constant dense<0.000000e+00> : vector<128x128xf32>
    %2 = tpu.matmul %0, %1, %cst {dimension_numbers = #tpu.dot_dimension_numbers<[1], [0], [0], [1], [0, 0, 1, 1], [], []>} : vector<128x4xbf16>, vector<4x128xbf16>, vector<128x128xf32> -> vector<128x128xf32>
    %c0_3 = arith.constant 0 : index
    %c0_4 = arith.constant 0 : index
    %3 = vector.load %arg3[%c0_3, %c0_4] : memref<128x1xf32, #tpu.memory_space<vmem>>, vector<128x1xf32>
    %4 = vector.broadcast %3 : vector<128x1xf32> to vector<128x128xf32>
    %5 = arith.addf %2, %4 : vector<128x128xf32>
    %cst_5 = arith.constant 0.000000e+00 : f32
    %6 = vector.broadcast %cst_5 : f32 to vector<128x128xf32>
    %7 = arith.maximumf %5, %6 : vector<128x128xf32>
    %c0_6 = arith.constant 0 : index
    %c0_7 = arith.constant 0 : index
    %8 = vector.load %arg4[%c0_6, %c0_7] : memref<1x128xbf16, #tpu.memory_space<vmem>>, vector<1x128xbf16>
    %9 = arith.truncf %7 : vector<128x128xf32> to vector<128x128xbf16>
    %cst_8 = arith.constant dense<0.000000e+00> : vector<1x128xf32>
    %10 = tpu.matmul %8, %9, %cst_8 {dimension_numbers = #tpu.dot_dimension_numbers<[1], [0], [0], [1], [0, 0, 1, 1], [], []>} : vector<1x128xbf16>, vector<128x128xbf16>, vector<1x128xf32> -> vector<1x128xf32>
    %c0_9 = arith.constant 0 : index
    %c0_10 = arith.constant 0 : index
    %11 = vector.load %arg5[%c0_9, %c0_10] : memref<1x1xf32, #tpu.memory_space<vmem>>, vector<1x1xf32>
    %12 = vector.broadcast %11 : vector<1x1xf32> to vector<1x128xf32>
    %13 = arith.addf %10, %12 : vector<1x128xf32>
    %cst_11 = arith.constant 5.000000e-01 : f32
    %14 = vector.broadcast %cst_11 : f32 to vector<1x128xf32>
    %15 = arith.mulf %14, %13 : vector<1x128xf32>
    %16 = math.tanh %15 : vector<1x128xf32>
    %cst_12 = arith.constant 5.000000e-01 : f32
    %17 = vector.broadcast %cst_12 : f32 to vector<1x128xf32>
    %18 = arith.mulf %17, %16 : vector<1x128xf32>
    %cst_13 = arith.constant 5.000000e-01 : f32
    %19 = vector.broadcast %cst_13 : f32 to vector<1x128xf32>
    %20 = arith.addf %19, %18 : vector<1x128xf32>
    %cst_14 = arith.constant 1.000000e+00 : f32
    %21 = vector.broadcast %cst_14 : f32 to vector<1x128xf32>
    %22 = arith.subf %21, %20 : vector<1x128xf32>
    %23 = tpu.concatenate %20, %22 in 0 : vector<1x128xf32>, vector<1x128xf32> -> vector<2x128xf32>
    %c0_15 = arith.constant 0 : index
    %c0_16 = arith.constant 0 : index
    %24 = vector.load %arg6[%c0_15, %c0_16] : memref<2x128xf32, #tpu.memory_space<vmem>>, vector<2x128xf32>
    tpu.vector_store %arg6[%c0_15, %c0_16], %23 {strides = array<i32>} : memref<2x128xf32, #tpu.memory_space<vmem>>, vector<2x128xf32>,
    return
  }
  func.func @transform_0(%arg0: i32) -> (i32, i32) {
    %c0_i32 = arith.constant 0 : i32
    %c0_i32_0 = arith.constant 0 : i32
    return %c0_i32, %arg0 : i32, i32
  }
  func.func @transform_1(%arg0: i32) -> (i32, i32) {
    %c0_i32 = arith.constant 0 : i32
    %c0_i32_0 = arith.constant 0 : i32
    %c0_i32_1 = arith.constant 0 : i32
    return %c0_i32, %c0_i32_0 : i32, i32
  }
  func.func @transform_2(%arg0: i32) -> (i32, i32) {
    %c0_i32 = arith.constant 0 : i32
    %c0_i32_0 = arith.constant 0 : i32
    %c0_i32_1 = arith.constant 0 : i32
    return %c0_i32, %c0_i32_0 : i32, i32
  }
  func.func @transform_3(%arg0: i32) -> (i32, i32) {
    %c0_i32 = arith.constant 0 : i32
    %c0_i32_0 = arith.constant 0 : i32
    %c0_i32_1 = arith.constant 0 : i32
    return %c0_i32, %c0_i32_0 : i32, i32
  }
  func.func @transform_4(%arg0: i32) -> (i32, i32) {
    %c0_i32 = arith.constant 0 : i32
    %c0_i32_0 = arith.constant 0 : i32
    %c0_i32_1 = arith.constant 0 : i32
    return %c0_i32, %c0_i32_0 : i32, i32
  }
  func.func @transform_5(%arg0: i32) -> (i32, i32) {
    %c0_i32 = arith.constant 0 : i32
    %c0_i32_0 = arith.constant 0 : i32
    return %c0_i32, %arg0 : i32, i32
  }
}

</mosaic_0001>

<bundles_post_ra>
// kernel: nn_policy_forward.1
= control target key start
LH: loop header
LB: loop body
LE: loop exit
PB: predicated region body
PF: predicated region fallthrough
CT: control target
= control target key end

     0   :  { %vm201_vm0 = vcmask 1041408   ;;  %vm176_vm1 = vcmask 31744   ;;  %v480_v1 = vmov 0   ;;  %v481_v29 = vmov 0.0   ;;  %s614_s0 = inlined_call_operand.vmem [shape: bf16[4,128], index: 0, kind: input, shape index: {}]   ;;  %s615_s1 = inlined_call_operand.vmem [shape: bf16[128,4], index: 1, kind: input, shape index: {}]   ;;  %s616_s4 = inlined_call_operand.<no memory space> [shape: f32[1,1], index: 4, kind: input, shape index: {}]   ;;  %s617_s2 = inlined_call_operand.vmem [shape: f32[128,1], index: 2, kind: input, shape index: {}]   ;;  %s618_s3 = inlined_call_operand.vmem [shape: bf16[1,128], index: 3, kind: input, shape index: {}]   ;;  %s619_s5 = inlined_call_operand.vmem [shape: f32[2,128], index: 5, kind: output, shape index: {}]  }
   0x1   :  { %v39_v0 = vld [vmem:[%s614_s0] sm:$0x3]  ;;  %468 = vset.pattern.permute.xlu0 %v480_v1  ;;  %469 = vset.pattern.permute.xlu1 %v480_v1  ;;  %v10_v2 = vstv %s616_s4  ;;  %v471_v5 = vld [vmem:[%s615_s1 + $0x8] sm:$0xff]   ;;  %v472_v6 = vld [vmem:[%s615_s1 + $0x10] sm:$0xff]   ;;  %vm482_vm2 = vmmov 0   ;;  %vm385_vm3 = vcmask 1040384  }
   0x2   :  { %464 = vmatprep.subr.msk.bf16.mxu0 %vm201_vm0, %v39_v0  ;;  %v203_v3 = vsel %vm201_vm0, %v39_v0, 0  ;;  %v470_v4 = vld [vmem:[%s615_s1] sm:$0xff]   ;;  %11 = vst [vmem:[#allocation2] sm:$0x1] %v10_v2  ;;  %v473_v8 = vld [vmem:[%s615_s1 + $0x18] sm:$0xff]   ;;  %v42_v9 = vld [vmem:[%s617_s2 + $0x10] sm:$0xff]  ;;  %444 = vmatprep.subr.bf16.mxu1 %v481_v29 }
   0x3   :  { %427 = vmatpush3.bf16.msra.mxu0 %v203_v3  ;;  %428 = vmatprep.mubr.msk.bf16.mxu0 %vm176_vm1, %v470_v4  ;;  %v40_v7 = vld [vmem:[%s617_s2] sm:$0xff]  ;;  %v41_v11 = vld [vmem:[%s617_s2 + $0x8] sm:$0xff]  ;;  %v43_v12 = vld [vmem:[%s617_s2 + $0x18] sm:$0xff] }
   0x4   :  { %58 = vperm.xlu0 %468, %v40_v7   ;;  %v474_v10 = vld [vmem:[%s615_s1 + $0x20] sm:$0xff]   ;;  %68 = vperm.xlu1 %469, %v42_v9   ;;  %v45_v14 = vld [vmem:[%s617_s2 + $0x28] sm:$0xff]  ;;  %v476_v16 = vld [vmem:[%s615_s1 + $0x30] sm:$0xff]  }
   0x5   :  { %v44_v13 = vld [vmem:[%s617_s2 + $0x20] sm:$0xff]  ;;  %v475_v15 = vld [vmem:[%s615_s1 + $0x28] sm:$0xff]   ;;  %v46_v17 = vld [vmem:[%s617_s2 + $0x30] sm:$0xff]  ;;  %460 = vmatprep.mubr.msk.bf16.mxu1 %vm482_vm2, %v481_v29 }
   0x6   :  { %429 = vmatmul.mubr.msk.bf16.vlgmr.msra.gmra.mrb[0].mxu0 %vm176_vm1, %v471_v5  ;;  %v47_v18 = vld [vmem:[%s617_s2 + $0x38] sm:$0xff]  ;;  %v48_v19 = vld [vmem:[%s617_s2 + $0x40] sm:$0xff]  ;;  %v49_v20 = vld [vmem:[%s617_s2 + $0x48] sm:$0xff] }
   0x7   :  { %432 = vmatprep.mubr.msk.bf16.mxu0 %vm176_vm1, %v472_v6  ;;  %v477_v21 = vld [vmem:[%s615_s1 + $0x38] sm:$0xff]   ;;  %v50_v22 = vld [vmem:[%s617_s2 + $0x50] sm:$0xff]  ;;  %v52_v24 = vld [vmem:[%s617_s2 + $0x60] sm:$0xff] }
   0x8   :  { %63 = vperm.xlu0 %468, %v41_v11   ;;  %73 = vperm.xlu1 %469, %v43_v12   ;;  %v51_v23 = vld [vmem:[%s617_s2 + $0x58] sm:$0xff]  ;;  %v53_v25 = vld [vmem:[%s617_s2 + $0x68] sm:$0xff]  ;;  %v54_v26 = vld [vmem:[%s617_s2 + $0x70] sm:$0xff] }
   0x9   :  { %v55_v27 = vld [vmem:[%s617_s2 + $0x78] sm:$0xff]  ;;  %v327_v28 = vld [vmem:[#allocation2] sm:$0x1] }
   0xc   :  { %78 = vperm.xlu0 %468, %v44_v13   ;;  %83 = vperm.xlu1 %469, %v45_v14  }
   0xe   :  { %433 = vmatmul.mubr.msk.bf16.gmra.mrb[4].mxu0 %vm176_vm1, %v473_v8 }
   0xf   :  { %436 = vmatprep.mubr.msk.bf16.mxu0 %vm176_vm1, %v474_v10 }
  0x10   :  { %88 = vperm.xlu0 %468, %v46_v17   ;;  %93 = vperm.xlu1 %469, %v47_v18  }
  0x14   :  { %98 = vperm.xlu0 %468, %v48_v19   ;;  %103 = vperm.xlu1 %469, %v49_v20  }
  0x16   :  { %437 = vmatmul.mubr.msk.bf16.gmra.mrb[8].mxu0 %vm176_vm1, %v475_v15 }
  0x17   :  { %440 = vmatprep.mubr.msk.bf16.mxu0 %vm176_vm1, %v476_v16 }
  0x18   :  { %108 = vperm.xlu0 %468, %v50_v22   ;;  %113 = vperm.xlu1 %469, %v51_v23  }
  0x1c   :  { %118 = vperm.xlu0 %468, %v52_v24   ;;  %123 = vperm.xlu1 %469, %v53_v25  }
  0x1e   :  { %441 = vmatmul.mubr.msk.bf16.gmra.mrb[12].mxu0 %vm176_vm1, %v477_v21 }
  0x20   :  { %128 = vperm.xlu0 %468, %v54_v26   ;;  %133 = vperm.xlu1 %469, %v55_v27  }
  0x24   :  { %330 = vperm.xlu0 %468, %v327_v28  }
  0x83   :  { %v59_v30 = vpop.permute.xlu0 %58  ;;  %v69_v31 = vpop.permute.xlu1 %68 }
  0x87   :  { %v64_v32 = vpop.permute.xlu0 %63  ;;  %v74_v33 = vpop.permute.xlu1 %73 }
  0x8b   :  { %v79_v34 = vpop.permute.xlu0 %78  ;;  %v84_v35 = vpop.permute.xlu1 %83 }
  0x8f   :  { %v89_v36 = vpop.permute.xlu0 %88  ;;  %v94_v40 = vpop.permute.xlu1 %93 }
  0x93   :  { %v99_v48 = vpop.permute.xlu0 %98  ;;  %v104_v52 = vpop.permute.xlu1 %103 }
  0x97   :  { %v109_v61 = vpop.permute.xlu0 %108  ;;  %v114_v1 = vpop.permute.xlu1 %113 }
  0x9b   :  { %v119_v9 = vpop.permute.xlu0 %118  ;;  %v124_v14 = vpop.permute.xlu1 %123 }
  0x9f   :  { %v129_v21 = vpop.permute.xlu0 %128  ;;  %v134_v26 = vpop.permute.xlu1 %133 }
  0xd9   :  { %v430_v37 = vpop.f32.mrb[0].mxu0 }
  0xda   :  { %v248_v38 = vadd.f32 %v430_v37, %v69_v31  ;;  %v239_v39 = vpop.f32.mrb[1].mxu0 }
  0xdb   :  { %v240_v41 = vadd.f32 %v239_v39, %v59_v30  ;;  %v431_v42 = vpop.f32.mrb[2].mxu0  ;;  %v318_v39 = vld [vmem:[%s618_s3] sm:$0x1] }
  0xdc   :  { %v251_v43 = vadd.f32 %v431_v42, %v74_v33  ;;  %v242_v44 = vpop.f32.mrb[3].mxu0  ;;  %v304_v46 = vmax.f32 %v248_v38, 0.0 }
  0xdd   :  { %v243_v45 = vadd.f32 %v242_v44, %v64_v32  ;;  %v302_v49 = vmax.f32 %v240_v41, 0.0 }
  0xde   :  { %v305_v47 = vmax.f32 %v251_v43, 0.0  ;;  %v331_v43 = vpop.permute.xlu0 %330 }
  0xdf   :  { %v303_v50 = vmax.f32 %v243_v45, 0.0 }
  0xe0   :  { %v320_v51 = vpack.c.bf16 %v305_v47, %v304_v46 }
  0xe1   :  { %v434_v53 = vpop.f32.mrb[4].mxu0  ;;  %v319_v54 = vpack.c.bf16 %v303_v50, %v302_v49 }
  0xe2   :  { %v264_v55 = vadd.f32 %v434_v53, %v89_v36  ;;  %v255_v56 = vpop.f32.mrb[5].mxu0 }
  0xe3   :  { %v256_v57 = vadd.f32 %v255_v56, %v79_v34  ;;  %v435_v58 = vpop.f32.mrb[6].mxu0  ;;  %445 = vmatpush3.bf16.msra.mxu1 %v319_v54 }
  0xe4   :  { %v267_v59 = vadd.f32 %v435_v58, %v94_v40  ;;  %v258_v60 = vpop.f32.mrb[7].mxu0  ;;  %446 = vmatprep.subr.bf16.mxu1 %v481_v29  ;;  %v308_v63 = vmax.f32 %v264_v55, 0.0  ;;  %v333_v40 = vlaneseq }
  0xe5   :  { %v259_v62 = vadd.f32 %v258_v60, %v84_v35  ;;  %v306_v2 = vmax.f32 %v256_v57, 0.0 }
  0xe6   :  { %v309_v0 = vmax.f32 %v267_v59, 0.0  ;;  %v334_v41 = vshrl.u32 %v333_v40, 7 }
  0xe7   :  { %v307_v3 = vmax.f32 %v259_v62, 0.0  ;;  %447 = vmatpush3.bf16.msra.mxu1 %v320_v51 }
  0xe8   :  { %v322_v4 = vpack.c.bf16 %v309_v0, %v308_v63  ;;  %448 = vmatprep.subr.bf16.mxu1 %v481_v29  ;;  %v335_v42 = vsub.s32 0, %v334_v41 }
  0xe9   :  { %v321_v5 = vpack.c.bf16 %v307_v3, %v306_v2  ;;  %v438_v6 = vpop.f32.mrb[8].mxu0 }
  0xea   :  { %v280_v7 = vadd.f32 %v438_v6, %v109_v61  ;;  %v271_v8 = vpop.f32.mrb[9].mxu0  ;;  %v336_v44 = vrot.slane %v331_v43, %v335_v42 }
  0xeb   :  { %v272_v10 = vadd.f32 %v271_v8, %v99_v48  ;;  %v439_v11 = vpop.f32.mrb[10].mxu0  ;;  %449 = vmatpush3.bf16.msra.mxu1 %v321_v5 }
  0xec   :  { %v283_v12 = vadd.f32 %v439_v11, %v114_v1  ;;  %v274_v13 = vpop.f32.mrb[11].mxu0  ;;  %450 = vmatprep.subr.bf16.mxu1 %v481_v29  ;;  %v312_v16 = vmax.f32 %v280_v7, 0.0 }
  0xed   :  { %v275_v15 = vadd.f32 %v274_v13, %v104_v52  ;;  %v310_v18 = vmax.f32 %v272_v10, 0.0 }
  0xee   :  { %v313_v17 = vmax.f32 %v283_v12, 0.0 }
  0xef   :  { %v311_v19 = vmax.f32 %v275_v15, 0.0  ;;  %451 = vmatpush3.bf16.msra.mxu1 %v322_v4 }
  0xf0   :  { %v324_v20 = vpack.c.bf16 %v313_v17, %v312_v16  ;;  %452 = vmatprep.subr.bf16.mxu1 %v481_v29 }
  0xf1   :  { %v323_v22 = vpack.c.bf16 %v311_v19, %v310_v18  ;;  %v442_v23 = vpop.f32.mrb[12].mxu0 }
  0xf2   :  { %v296_v24 = vadd.f32 %v442_v23, %v129_v21  ;;  %v287_v25 = vpop.f32.mrb[13].mxu0 }
  0xf3   :  { %v288_v27 = vadd.f32 %v287_v25, %v119_v9  ;;  %v443_v28 = vpop.f32.mrb[14].mxu0  ;;  %453 = vmatpush3.bf16.msra.mxu1 %v323_v22 }
  0xf4   :  { %v299_v30 = vadd.f32 %v443_v28, %v134_v26  ;;  %v290_v31 = vpop.f32.mrb[15].mxu0  ;;  %454 = vmatprep.subr.bf16.mxu1 %v481_v29  ;;  %v316_v33 = vmax.f32 %v296_v24, 0.0 }
  0xf5   :  { %v291_v32 = vadd.f32 %v290_v31, %v124_v14  ;;  %v314_v35 = vmax.f32 %v288_v27, 0.0 }
  0xf6   :  { %v317_v34 = vmax.f32 %v299_v30, 0.0 }
  0xf7   :  { %v315_v36 = vmax.f32 %v291_v32, 0.0  ;;  %455 = vmatpush3.bf16.msra.mxu1 %v324_v20 }
  0xf8   :  { %v326_v37 = vpack.c.bf16 %v317_v34, %v316_v33  ;;  %456 = vmatprep.subr.bf16.mxu1 %v481_v29 }
  0xf9   :  { %v325_v38 = vpack.c.bf16 %v315_v36, %v314_v35 }
  0xfb   :  { %457 = vmatpush3.bf16.msra.mxu1 %v325_v38 }
  0xfc   :  { %458 = vmatprep.subr.bf16.mxu1 %v481_v29 }
  0xff   :  { %459 = vmatpush3.bf16.msra.mxu1 %v326_v37 }
 0x102   :  { %461 = vmatmul.mubr.bf16.vlgmr.msra.gmra.mrb[0].mxu1 %v318_v39 }
 0x1d5   :  { %v371_v45 = vpop.f32.mrb[0].mxu1 }
 0x1d6   :  { %v372_v46 = vadd.f32 %v371_v45, %v336_v44  ;;  %v462_v47 = vpop.f32.mrb[1].mxu1 }
 0x1d7   :  { %v374_v48 = vpop.f32.mrb[2].mxu1 }
 0x1d8   :  { %v377_v49 = vmul.f32 0.5, %v372_v46  ;;  %v463_v50 = vpop.f32.mrb[3].mxu1 }
 0x1da   :  { %478 = vtanh.f32 %v377_v49 }
 0x1e4   :  { %v479_v51 = vpop.eup %478 }
 0x1e5   :  { %v379_v29 = vmul.f32 0.5, %v479_v51 }
 0x1e7   :  { %v380_v52 = vadd.f32 0.5, %v379_v29 }
 0x1e9   :  { %v381_v53 = vsub.f32 1.0, %v380_v52 }
 0x1eb   :  { %v383_v54 = vrot.slane %v381_v53, 7 }
 0x1ed   :  { %v386_v55 = vsel %vm385_vm3, %v380_v52, %v383_v54 }
 0x1ee   :  { %387 = vst [vmem:[%s619_s5] sm:$0x3] %v386_v55 }

</bundles_post_ra>
